<compile_context>
chip_gen: v7x
topology: tpu7x:2x2x1
jax: 0.10.0
libtpu: 0.0.40
codegen_flags: <defaults>
</compile_context>

<pallas_src>
import functools

import jax
import jax.numpy as jnp
from jax.experimental import pallas as pl
from jax.experimental.pallas import tpu as pltpu


# --------------------------------------------------------------------------
# Pallas kernels
# --------------------------------------------------------------------------

def _patch_embed_kernel(n, n_pad, p_ref, w_ref, b_ref, pos_ref, cls_ref, o_ref):
    # p_ref: (1, n, P) f32   w_ref: (P, D) bf16   b_ref: (1, D) f32
    # pos_ref: (n, D) f32    cls_ref: (1, D) f32  o_ref: (1, n_pad, D) f32
    tok = jnp.dot(p_ref[0].astype(jnp.bfloat16), w_ref[...],
                  preferred_element_type=jnp.float32)
    tok = tok + b_ref[...] + pos_ref[...]
    # direct slice stores (no jnp.concatenate -> no extra VMEM copy)
    o_ref[0, pl.ds(0, 1), :] = cls_ref[...]
    o_ref[0, pl.ds(1, n), :] = tok
    if n_pad > n + 1:
        o_ref[0, pl.ds(n + 1, n_pad - n - 1), :] = jnp.zeros(
            (n_pad - n - 1, tok.shape[1]), jnp.float32)


def _hom_stack_kernel(order, ed, n_valid, eps,
                      x_ref,
                      g1_ref, be1_ref,
                      wh1_ref, bh1_ref, whh_ref, bhh_ref,
                      wo_ref, bo_ref,
                      g2_ref, be2_ref,
                      w1_ref, bf1_ref, w2_ref, bf2_ref,
                      o_ref):
    # grid = (B, L): batch outer ("parallel"), layer inner ("arbitrary").
    # The output block index is constant along the layer axis, so o_ref is the
    # VMEM-resident carry of the token activations across layers.
    l = pl.program_id(1)

    @pl.when(l == 0)
    def _():
        o_ref[0] = x_ref[0]

    x = o_ref[0]                                          # (Np, D) f32

    # ---- LayerNorm 1 ----
    mu = jnp.mean(x, axis=-1, keepdims=True)
    var = jnp.mean((x - mu) ** 2, axis=-1, keepdims=True)
    xn = (x - mu) * jax.lax.rsqrt(var + eps) * g1_ref[0] + be1_ref[0]

    # ---- high-order token mixing ----
    xn_b = xn.astype(jnp.bfloat16)
    # 1st-order term: per-token (the only full-size matmul of this branch)
    y = jnp.dot(xn_b, wh1_ref[0],
                preferred_element_type=jnp.float32) + bh1_ref[0]       # (Np, ed)

    # higher-order global "moments": token-mean taken BEFORE the matmul
    # (mean is linear), excluding padded rows.
    n_pad = x.shape[0]
    row_ids = jax.lax.broadcasted_iota(jnp.int32, (n_pad, 1), 0)
    valid = (row_ids < n_valid).astype(jnp.float32)
    xn_mean = jnp.sum(xn * valid, axis=0, keepdims=True) * (1.0 / n_valid)
    ctx = jnp.dot(xn_mean.astype(jnp.bfloat16), whh_ref[0],
                  preferred_element_type=jnp.float32) + bhh_ref[0]     # (1,(order-1)*ed)
    # fold all higher-order gates into one (1, ed) multiplier
    ctx_prod = ctx[:, :ed]
    for i in range(1, order - 1):
        ctx_prod = ctx_prod * ctx[:, i * ed:(i + 1) * ed]
    y = y * ctx_prod

    x = x + jnp.dot(y.astype(jnp.bfloat16), wo_ref[0],
                    preferred_element_type=jnp.float32) + bo_ref[0]

    # ---- LayerNorm 2 + FFW (GELU, tanh approximation) ----
    mu2 = jnp.mean(x, axis=-1, keepdims=True)
    var2 = jnp.mean((x - mu2) ** 2, axis=-1, keepdims=True)
    xn2 = (x - mu2) * jax.lax.rsqrt(var2 + eps) * g2_ref[0] + be2_ref[0]
    f = jnp.dot(xn2.astype(jnp.bfloat16), w1_ref[0],
                preferred_element_type=jnp.float32) + bf1_ref[0]
    f = 0.5 * f * (1.0 + jnp.tanh(0.7978845608028654 * (f + 0.044715 * f * f * f)))
    x = x + jnp.dot(f.astype(jnp.bfloat16), w2_ref[0],
                    preferred_element_type=jnp.float32) + bf2_ref[0]

    o_ref[0] = x


def _head_kernel(x_ref, w_ref, b_ref, o_ref):
    # x_ref: (tm, D) f32  w_ref: (D, Cp) bf16  b_ref: (1, Cp) f32  o_ref: (tm, Cp)
    o_ref[...] = (jnp.dot(x_ref[...].astype(jnp.bfloat16), w_ref[...],
                          preferred_element_type=jnp.float32) + b_ref[...])


# --------------------------------------------------------------------------
# pallas_call wrappers
# --------------------------------------------------------------------------

def patch_embed(patches, w, b, pos, cls, n_pad):
    B, n, P = patches.shape
    D = w.shape[1]
    kernel = functools.partial(_patch_embed_kernel, n, n_pad)
    return pl.pallas_call(
        kernel,
        out_shape=jax.ShapeDtypeStruct((B, n_pad, D), jnp.float32),
        grid=(B,),
        in_specs=[
            pl.BlockSpec((1, n, P), lambda i: (i, 0, 0)),
            pl.BlockSpec((P, D), lambda i: (0, 0)),
            pl.BlockSpec((1, D), lambda i: (0, 0)),
            pl.BlockSpec((n, D), lambda i: (0, 0)),
            pl.BlockSpec((1, D), lambda i: (0, 0)),
        ],
        out_specs=pl.BlockSpec((1, n_pad, D), lambda i: (i, 0, 0)),
        compiler_params=pltpu.CompilerParams(dimension_semantics=("parallel",)),
    )(patches, w, b, pos, cls)


def hom_stack(x, params, order, order_expand, ffw_expand, n_valid):
    B, n_pad, D = x.shape
    L = params["WH1"].shape[0]
    ed = order_expand * D
    hd = (order - 1) * ed
    fd = ffw_expand * D
    kernel = functools.partial(_hom_stack_kernel, order, ed, n_valid, 1e-5)

    def wspec(shp):
        return pl.BlockSpec(shp, lambda b, l: (l, 0, 0))

    return pl.pallas_call(
        kernel,
        out_shape=jax.ShapeDtypeStruct((B, n_pad, D), jnp.float32),
        grid=(B, L),
        in_specs=[
            pl.BlockSpec((1, n_pad, D), lambda b, l: (b, 0, 0)),   # tokens
            wspec((1, 1, D)), wspec((1, 1, D)),                    # ln1 gamma/beta
            wspec((1, D, ed)), wspec((1, 1, ed)),                  # wh (1st order), bh
            wspec((1, D, hd)), wspec((1, 1, hd)),                  # wh (higher), bh
            wspec((1, ed, D)), wspec((1, 1, D)),                   # wo, bo
            wspec((1, 1, D)), wspec((1, 1, D)),                    # ln2 gamma/beta
            wspec((1, D, fd)), wspec((1, 1, fd)),                  # w1, b1
            wspec((1, fd, D)), wspec((1, 1, D)),                   # w2, b2
        ],
        out_specs=pl.BlockSpec((1, n_pad, D), lambda b, l: (b, 0, 0)),
        compiler_params=pltpu.CompilerParams(
            dimension_semantics=("parallel", "arbitrary"),
            vmem_limit_bytes=48 * 1024 * 1024),
    )(x, params["G1"], params["BE1"], params["WH1"], params["BH1"],
      params["WHH"], params["BHH"], params["WO"], params["BO"],
      params["G2"], params["BE2"], params["W1"], params["BF1"],
      params["W2"], params["BF2"])


def head(x2d, w, b):
    M, D = x2d.shape
    Cp = w.shape[1]
    tm = M
    for cand in (512, 256, 128, 64, 32, 16, 8):
        if M % cand == 0:
            tm = cand
            break
    return pl.pallas_call(
        _head_kernel,
        out_shape=jax.ShapeDtypeStruct((M, Cp), jnp.float32),
        grid=(M // tm,),
        in_specs=[
            pl.BlockSpec((tm, D), lambda i: (i, 0)),
            pl.BlockSpec((D, Cp), lambda i: (0, 0)),
            pl.BlockSpec((1, Cp), lambda i: (0, 0)),
        ],
        out_specs=pl.BlockSpec((tm, Cp), lambda i: (i, 0)),
        compiler_params=pltpu.CompilerParams(dimension_semantics=("parallel",)),
    )(x2d, w, b)


# --------------------------------------------------------------------------
# Model (parameter construction = glue, compute = Pallas)
# --------------------------------------------------------------------------

def _xavier(key, shape, fan_in, fan_out):
    limit = (6.0 / (fan_in + fan_out)) ** 0.5
    return jax.random.uniform(key, shape, jnp.float32, -limit, limit)


class HoMVisionPallas:
    def __init__(self, nb_classes, dim=256, im_size=256, kernel_size=16,
                 nb_layers=12, order=4, order_expand=8, ffw_expand=4,
                 pooling="cls", in_conv=True, seed=0):
        assert order >= 2  # TODO(synk): order==1 (no higher-order gating) not supported
        self.nb_classes = nb_classes
        self.dim = dim
        self.im_size = im_size
        self.kernel_size = kernel_size
        self.nb_layers = nb_layers
        self.order = order
        self.order_expand = order_expand
        self.ffw_expand = ffw_expand
        self.pooling = pooling
        self.in_conv = in_conv

        n = (im_size // kernel_size) ** 2
        self.n = n
        self.N = n + 1                                  # +1 CLS token
        self.Np = ((self.N + 7) // 8) * 8               # sublane-aligned token count
        keys = iter(jax.random.split(jax.random.PRNGKey(seed), 8 + 4 * nb_layers))

        # patch-embedding conv (3 -> dim, k x k, stride k) as a matmul weight (bf16)
        P = 3 * kernel_size * kernel_size
        if in_conv:
            wconv = _xavier(next(keys), (dim, 3, kernel_size, kernel_size), P, dim)
            self.conv_w = wconv.reshape(dim, P).T.astype(jnp.bfloat16)   # (P, D)
            self.conv_b = jnp.zeros((1, dim), jnp.float32)
        else:
            self.conv_w = None

        self.position = 0.02 * jax.random.truncated_normal(
            next(keys), -2.0, 2.0, (n, dim)).astype(jnp.float32)
        self.cls = 0.02 * jax.random.truncated_normal(
            next(keys), -2.0, 2.0, (1, dim)).astype(jnp.float32)

        ed = order_expand * dim
        oed = order * ed
        hd = (order - 1) * ed
        fd = ffw_expand * dim

        G1, BE1, WH1, BH1, WHH, BHH, WO, BO = [], [], [], [], [], [], [], []
        G2, BE2, W1, BF1, W2, BF2 = [], [], [], [], [], []
        for _ in range(nb_layers):
            wh = _xavier(next(keys), (dim, oed), dim, oed)
            WH1.append(wh[:, :ed])          # 1st-order columns
            WHH.append(wh[:, ed:])          # higher-order (moment) columns
            BH1.append(jnp.zeros((1, ed), jnp.float32))
            BHH.append(jnp.zeros((1, hd), jnp.float32))
            WO.append(_xavier(next(keys), (ed, dim), ed, dim))
            BO.append(jnp.zeros((1, dim), jnp.float32))
            W1.append(_xavier(next(keys), (dim, fd), dim, fd))
            BF1.append(jnp.zeros((1, fd), jnp.float32))
            W2.append(_xavier(next(keys), (fd, dim), fd, dim))
            BF2.append(jnp.zeros((1, dim), jnp.float32))
            G1.append(jnp.ones((1, dim), jnp.float32))
            BE1.append(jnp.zeros((1, dim), jnp.float32))
            G2.append(jnp.ones((1, dim), jnp.float32))
            BE2.append(jnp.zeros((1, dim), jnp.float32))

        # weights stacked along a leading layer axis; big matmul weights in bf16
        self.params = dict(
            G1=jnp.stack(G1), BE1=jnp.stack(BE1),
            WH1=jnp.stack(WH1).astype(jnp.bfloat16), BH1=jnp.stack(BH1),
            WHH=jnp.stack(WHH).astype(jnp.bfloat16), BHH=jnp.stack(BHH),
            WO=jnp.stack(WO).astype(jnp.bfloat16), BO=jnp.stack(BO),
            G2=jnp.stack(G2), BE2=jnp.stack(BE2),
            W1=jnp.stack(W1).astype(jnp.bfloat16), BF1=jnp.stack(BF1),
            W2=jnp.stack(W2).astype(jnp.bfloat16), BF2=jnp.stack(BF2),
        )

        # out_proj: weight zero-init; bias -6.9 for cls pooling (as in reference).
        # Classes padded to a lane-dense multiple of 128; padding sliced off in glue.
        self.Cp = ((nb_classes + 127) // 128) * 128
        self.out_w = jnp.zeros((dim, self.Cp), jnp.bfloat16)
        bias_val = -6.9 if pooling == "cls" else 0.0
        self.out_b = jnp.full((1, self.Cp), bias_val, jnp.float32)

    def __call__(self, x):
        # x: (B, 3, H, W) NCHW, H == W == im_size
        k = self.kernel_size
        if self.in_conv:
            B, C, H, W = x.shape
            hk, wk = H // k, W // k
            # NCHW -> (B, n, C*k*k), feature order (c, ki, kj) matching Conv2d weights
            p = x.reshape(B, C, hk, k, wk, k)
            p = p.transpose(0, 2, 4, 1, 3, 5).reshape(B, hk * wk, C * k * k)
        else:
            raise NotImplementedError("in_conv=False path expects token input")
            # TODO(synk): token-input (in_conv=False) path not implemented.
        # TODO(synk): bicubic re-interpolation of `position` when n != (im_size/k)^2
        # is not implemented (not hit in this configuration).
        # TODO(synk): optional token mask path (mask != None) not implemented.
        tokens = patch_embed(p, self.conv_w, self.conv_b, self.position, self.cls,
                             self.Np)
        tokens = hom_stack(tokens, self.params, self.order, self.order_expand,
                           self.ffw_expand, self.N)

        if self.pooling == "cls":
            logits = head(tokens[:, 0, :], self.out_w, self.out_b)
            return logits[:, :self.nb_classes]                    # (B, nb_classes)
        Bn = tokens.shape[0]
        flat = tokens[:, :self.N, :].reshape(Bn * self.N, self.dim)
        out = head(flat, self.out_w, self.out_b)[:, :self.nb_classes]
        return out.reshape(Bn, self.N, self.nb_classes)[:, 1:, :]


# --------------------------------------------------------------------------

if __name__ == "__main__":
    key = jax.random.PRNGKey(0)
    x = jax.random.normal(key, (2, 3, 16, 16), jnp.float32)   # NCHW

    model = HoMVisionPallas(
        nb_classes=10, dim=32, im_size=16, kernel_size=8,
        nb_layers=2, order=4, order_expand=8, ffw_expand=4,
        pooling="cls", in_conv=True, seed=0)

    out = model(x)
    out = jax.block_until_ready(out)
    assert out.shape == (2, 10), out.shape
    assert jnp.all(jnp.isfinite(out))
    print("KERNEL_OK")
</pallas_src>

<mosaic_0001>
module attributes {stable_mosaic.version = 11 : i64} {
  func.func @_patch_embed_kernel(%arg0: i32, %arg1: memref<1x4x192xf32, #tpu.memory_space<vmem>>, %arg2: memref<192x32xbf16, #tpu.memory_space<vmem>>, %arg3: memref<1x32xf32, #tpu.memory_space<vmem>>, %arg4: memref<4x32xf32, #tpu.memory_space<vmem>>, %arg5: memref<1x32xf32, #tpu.memory_space<vmem>>, %arg6: memref<1x8x32xf32, #tpu.memory_space<vmem>>) attributes {dimension_semantics = [#tpu.dimension_semantics<parallel>], iteration_bounds = array<i64: 2>, scalar_prefetch = 0 : i64, scratch_operands = 0 : i64, tpu.core_type = #tpu.core_type<tc>, window_params = [{transform_indices = @transform_0, window_bounds = array<i64: 1, 4, 192>}, {pipeline_mode = #tpu.pipeline_mode<synchronous>, transform_indices = @transform_1, window_bounds = array<i64: 192, 32>}, {pipeline_mode = #tpu.pipeline_mode<synchronous>, transform_indices = @transform_2, window_bounds = array<i64: 1, 32>}, {pipeline_mode = #tpu.pipeline_mode<synchronous>, transform_indices = @transform_3, window_bounds = array<i64: 4, 32>}, {pipeline_mode = #tpu.pipeline_mode<synchronous>, transform_indices = @transform_4, window_bounds = array<i64: 1, 32>}, {transform_indices = @transform_5, window_bounds = array<i64: 1, 8, 32>}]} {
    %c0 = arith.constant 0 : index
    %c0_0 = arith.constant 0 : index
    %c0_1 = arith.constant 0 : index
    %0 = vector.load %arg1[%c0, %c0_0, %c0_1] : memref<1x4x192xf32, #tpu.memory_space<vmem>>, vector<1x4x192xf32>
    %1 = vector.shape_cast %0 : vector<1x4x192xf32> to vector<4x192xf32>
    %2 = arith.truncf %1 : vector<4x192xf32> to vector<4x192xbf16>
    %c0_2 = arith.constant 0 : index
    %c0_3 = arith.constant 0 : index
    %3 = vector.load %arg2[%c0_2, %c0_3] : memref<192x32xbf16, #tpu.memory_space<vmem>>, vector<192x32xbf16>
    %cst = arith.constant dense<0.000000e+00> : vector<4x32xf32>
    %4 = tpu.matmul %2, %3, %cst {dimension_numbers = #tpu.dot_dimension_numbers<[1], [0], [0], [1], [0, 0, 1, 1], [], []>} : vector<4x192xbf16>, vector<192x32xbf16>, vector<4x32xf32> -> vector<4x32xf32>
    %c0_4 = arith.constant 0 : index
    %c0_5 = arith.constant 0 : index
    %5 = vector.load %arg3[%c0_4, %c0_5] : memref<1x32xf32, #tpu.memory_space<vmem>>, vector<1x32xf32>
    %6 = vector.broadcast %5 : vector<1x32xf32> to vector<4x32xf32>
    %7 = arith.addf %4, %6 : vector<4x32xf32>
    %c0_6 = arith.constant 0 : index
    %c0_7 = arith.constant 0 : index
    %8 = vector.load %arg4[%c0_6, %c0_7] : memref<4x32xf32, #tpu.memory_space<vmem>>, vector<4x32xf32>
    %9 = arith.addf %7, %8 : vector<4x32xf32>
    %c0_8 = arith.constant 0 : index
    %c0_9 = arith.constant 0 : index
    %10 = vector.load %arg5[%c0_8, %c0_9] : memref<1x32xf32, #tpu.memory_space<vmem>>, vector<1x32xf32>
    %c0_10 = arith.constant 0 : index
    %c0_11 = arith.constant 0 : index
    %c0_12 = arith.constant 0 : index
    %11 = vector.load %arg6[%c0_10, %c0_11, %c0_12] : memref<1x8x32xf32, #tpu.memory_space<vmem>>, vector<1x1x32xf32>
    %12 = vector.shape_cast %11 : vector<1x1x32xf32> to vector<1x32xf32>
    %13 = vector.shape_cast %10 : vector<1x32xf32> to vector<1x1x32xf32>
    tpu.vector_store %arg6[%c0_10, %c0_11, %c0_12], %13 {strides = array<i32>} : memref<1x8x32xf32, #tpu.memory_space<vmem>>, vector<1x1x32xf32>,
    %c0_13 = arith.constant 0 : index
    %c1 = arith.constant 1 : index
    %c0_14 = arith.constant 0 : index
    %14 = vector.load %arg6[%c0_13, %c1, %c0_14] : memref<1x8x32xf32, #tpu.memory_space<vmem>>, vector<1x4x32xf32>
    %15 = vector.shape_cast %14 : vector<1x4x32xf32> to vector<4x32xf32>
    %16 = vector.shape_cast %9 : vector<4x32xf32> to vector<1x4x32xf32>
    tpu.vector_store %arg6[%c0_13, %c1, %c0_14], %16 {strides = array<i32>} : memref<1x8x32xf32, #tpu.memory_space<vmem>>, vector<1x4x32xf32>,
    %cst_15 = arith.constant 0.000000e+00 : f32
    %17 = vector.broadcast %cst_15 : f32 to vector<3x32xf32>
    %c0_16 = arith.constant 0 : index
    %c5 = arith.constant 5 : index
    %c0_17 = arith.constant 0 : index
    %18 = vector.load %arg6[%c0_16, %c5, %c0_17] : memref<1x8x32xf32, #tpu.memory_space<vmem>>, vector<1x3x32xf32>
    %19 = vector.shape_cast %18 : vector<1x3x32xf32> to vector<3x32xf32>
    %20 = vector.shape_cast %17 : vector<3x32xf32> to vector<1x3x32xf32>
    tpu.vector_store %arg6[%c0_16, %c5, %c0_17], %20 {strides = array<i32>} : memref<1x8x32xf32, #tpu.memory_space<vmem>>, vector<1x3x32xf32>,
    return
  }
  func.func @transform_0(%arg0: i32) -> (i32, i32, i32) {
    %c0_i32 = arith.constant 0 : i32
    %c0_i32_0 = arith.constant 0 : i32
    %c0_i32_1 = arith.constant 0 : i32
    return %arg0, %c0_i32, %c0_i32_0 : i32, i32, i32
  }
  func.func @transform_1(%arg0: i32) -> (i32, i32) {
    %c0_i32 = arith.constant 0 : i32
    %c0_i32_0 = arith.constant 0 : i32
    %c0_i32_1 = arith.constant 0 : i32
    return %c0_i32, %c0_i32_0 : i32, i32
  }
  func.func @transform_2(%arg0: i32) -> (i32, i32) {
    %c0_i32 = arith.constant 0 : i32
    %c0_i32_0 = arith.constant 0 : i32
    %c0_i32_1 = arith.constant 0 : i32
    return %c0_i32, %c0_i32_0 : i32, i32
  }
  func.func @transform_3(%arg0: i32) -> (i32, i32) {
    %c0_i32 = arith.constant 0 : i32
    %c0_i32_0 = arith.constant 0 : i32
    %c0_i32_1 = arith.constant 0 : i32
    return %c0_i32, %c0_i32_0 : i32, i32
  }
  func.func @transform_4(%arg0: i32) -> (i32, i32) {
    %c0_i32 = arith.constant 0 : i32
    %c0_i32_0 = arith.constant 0 : i32
    %c0_i32_1 = arith.constant 0 : i32
    return %c0_i32, %c0_i32_0 : i32, i32
  }
  func.func @transform_5(%arg0: i32) -> (i32, i32, i32) {
    %c0_i32 = arith.constant 0 : i32
    %c0_i32_0 = arith.constant 0 : i32
    %c0_i32_1 = arith.constant 0 : i32
    return %arg0, %c0_i32, %c0_i32_0 : i32, i32, i32
  }
}

</mosaic_0001>

<bundles_post_ra>
// kernel: tpu_custom_call.1
= control target key start
LH: loop header
LB: loop body
LE: loop exit
PB: predicated region body
PF: predicated region fallthrough
CT: control target
= control target key end

     0   :  { %10 = vsyncpa [#allocation3], 0  ;;  %s781_s0 = inlined_call_operand.vmem [shape: f32[2,4,192], index: 0, kind: input, shape index: {}]   ;;  %s782_s1 = inlined_call_operand.vmem [shape: bf16[192,32], index: 1, kind: input, shape index: {}]   ;;  %s783_s2 = inlined_call_operand.vmem [shape: f32[1,32], index: 2, kind: input, shape index: {}]   ;;  %s784_s3 = inlined_call_operand.vmem [shape: f32[4,32], index: 3, kind: input, shape index: {}]   ;;  %s785_s4 = inlined_call_operand.vmem [shape: f32[1,32], index: 4, kind: input, shape index: {}]   ;;  %s786_s5 = inlined_call_operand.hbm [shape: f32[2,8,32], index: 5, kind: output, shape index: {}]  }
   0x1   :  { %12 = vsyncpa [#allocation3 + $0x1], 0  ;;  %s636_s18 = smov 0   ;;  %s638_s19 = smov 0  }
   0x2   :  { %s640_s20 = smov 0   ;;  %s642_s21 = smov 0  }
   0x3 LB: > { %s657_s22 = sadd.s32 4294967295, %s601_s21   ;;  %s459_s23 = sadd.s32 4294967294, %s601_s21   ;;  %s601_s21 = sphi %s642_s21, %s792_s21   ;;  %s597_s20 = sphi %s640_s20, %s791_s20   ;;  %s593_s19 = sphi %s638_s19, %s790_s19   ;;  %s589_s18 = sphi %s636_s18, %s789_s18  }
   0x4   : > { %s661_s24 = sadd.s32 1, %s601_s21   ;;  %s135_s25 = sadd.s32 1, %s597_s20 }
   0x5   : > { %s132_s26 = ssub.s32 %s601_s21, %s661_s24  ;;  %p145_p0 = scmp.ne.s32.totalorder %s597_s20, %s593_s19 }
   0x6   : > { %p133_p1 = scmp.eq.s32.totalorder %s132_s26, 0  ;;  %p146_p2 = scmp.eq.s32.totalorder %s657_s22, 1 }
   0x7   : > { %p151_p3 = scmp.ne.s32.totalorder %s593_s19, %s589_s18  ;;  %p152_p4 = scmp.eq.s32.totalorder %s459_s23, 1 }
   0x8   : > { %s672_s27 = scalar_select %p133_p1, %s597_s20, %s135_s25  }
   0x9   : > { %p674_p5 = por %p146_p2, %p145_p0  ;;  %p678_p6 = por %p152_p4, %p151_p3 }
   0xa   : > { %p462_p7 = scmp.ge.s32.totalorder %s601_s21, 1  ;;  %p190_p8 = scmp.lt.s32.totalorder %s601_s21, 3 }
   0xc   : > { %p191_p9 = pnand %p462_p7, %p190_p8 }
   0xd   : > { %v526_v0 = vld [vmem:[%s782_s1] sm:$0xff] (!%p191_p9)   ;;  %v603_v1 = vmov (!%p191_p9), 0   ;;  %p218_p10 = scmp.lt.s32.totalorder (!%p191_p9), %s657_s22, 1  ;;  %v527_v2 = vld [vmem:[%s782_s1 + $0x8] sm:$0xff] (!%p191_p9)   ;;  %v528_v3 = vld [vmem:[%s782_s1 + $0x10] sm:$0xff] (!%p191_p9)   ;;  %vm333_vm0 = vcmask (!%p191_p9), 523264  }
   0xe   : > { %194 = sbr.rel (%p191_p9) target bundleno = 292 (0x124), region = 40  ;;  %337 = vmatprep.subr.bf16.mxu0 (!%p191_p9), %v603_v1  ;;  %v529_v4 = vld [vmem:[%s782_s1 + $0x18] sm:$0xff] (!%p191_p9)   ;;  %v530_v7 = vld [vmem:[%s782_s1 + $0x20] sm:$0xff] (!%p191_p9)   ;;  %v531_v9 = vld [vmem:[%s782_s1 + $0x28] sm:$0xff] (!%p191_p9)   ;;  %s215_s23 = sand.u32 (!%p191_p9), 1, %s593_s19   ;;  %vm380_vm1 = vcmask (!%p191_p9), 253952  }
   0xf   : > { %338 = vmatpush1.bf16.msra.mxu0 (!%p191_p9), %v526_v0  ;;  %v532_v10 = vld [vmem:[%s782_s1 + $0x30] sm:$0xff] (!%p191_p9)   ;;  %v533_v11 = vld [vmem:[%s782_s1 + $0x38] sm:$0xff] (!%p191_p9)   ;;  %v534_v12 = vld [vmem:[%s782_s1 + $0x40] sm:$0xff] (!%p191_p9)   ;;  %s463_s25 = sshll.u32 (!%p191_p9), %s215_s23, 3  ;;  %vm384_vm2 = vcmask (!%p191_p9), 256000   ;;  %v604_v18 = vmov (!%p191_p9), 0.0  }
  0x10   : > { %339 = vmatprep.subr.bf16.mxu0 (!%p191_p9), %v603_v1  ;;  %v535_v13 = vld [vmem:[%s782_s1 + $0x48] sm:$0xff] (!%p191_p9)   ;;  %v536_v14 = vld [vmem:[%s782_s1 + $0x50] sm:$0xff] (!%p191_p9)   ;;  %v537_v15 = vld [vmem:[%s782_s1 + $0x58] sm:$0xff] (!%p191_p9)   ;;  %s217_s6 = scalar_lea.vmem (!%p191_p9), [#allocation2], %s463_s25  ;;  %s481_s11 = sshll.u32 (!%p191_p9), %s657_s22, 7  ;;  %vm382_vm3 = vcmask (!%p191_p9), 257024  }
  0x11   : > { %v379_v17 = vld [vmem:[%s785_s4] sm:$0x1] (!%p191_p9)  ;;  %385 = vst.msk [vmem:[%s217_s6 + $0x5] sm:$0x7] (!%p191_p9), %vm384_vm2, %v604_v18  ;;  %s387_s16 = scalar_lea.sflag (!%p191_p9), [#allocation3], %s215_s23  ;;  %s605_s17 = smov (!%p191_p9), [#allocation2]  }
  0x12   : > { %381 = vst.msk [vmem:[%s217_s6] sm:$0x1] (!%p191_p9), %vm380_vm1, %v379_v17  ;;  %v466_v19 = vld [vmem:[%s783_s2] ss:$0 sm:$0xff] (!%p191_p9)  ;;  %s543_s25 = sshll.u32 (!%p191_p9), %s605_s17, 4  ;;  %s544_s25 = int_to_ptr.vmem [resolvable:$false] %s543_s25 }
  0x13   : > { %340 = vmatpush1.bf16.msra.mxu0 (!%p191_p9), %v527_v2  ;;  %v377_v21 = vld [vmem:[%s784_s3] sm:$0xf] (!%p191_p9)  ;;  %s545_s26 = scalar_lea.vmem (!%p191_p9), %s544_s25, 256 }
  0x14   : > { %341 = vmatprep.subr.bf16.mxu0 (!%p191_p9), %v603_v1 }
  0x15   : > { %s219_s9 = scalar_select %p218_p10, %s657_s22, 1 }
  0x17   : > { %s484_s12 = sshll.u32 %s219_s9, 3  ;;  %342 = vmatpush1.bf16.msra.mxu0 %v528_v3 }
  0x18   : > { %s222_s15 = scalar_lea.vmem %s781_s0, %s484_s12  ;;  %343 = vmatprep.subr.bf16.mxu0 %v603_v1  ;;  %s400_s12 = sshll.u32 %s217_s6, 4  ;;  %s741_s12 = int_to_ptr.vmem [resolvable:$true] %s400_s12 }
  0x19   : > { %v224_v5 = vld [vmem:[%s222_s15] sm:$0xff]  ;;  %s739_s15 = scalar_lea.hbm %s786_s5, %s481_s11  ;;  %s539_s22 = scalar_lea.vmem %s741_s12, 128 }
  0x1a   : > { %v226_v6 = vcombine.high %v224_v5, %v224_v5  ;;  %v228_v16 = vpack.c.bf16 %v224_v5, %v224_v5  ;;  %p540_p11 = scmp.ne.s32.totalorder %s741_s12, %s539_s22  ;;  %p546_p0 = scmp.lt.s32.totalorder %s741_s12, %s544_s25 }
  0x1b   : > { %344 = vmatpush1.bf16.msra.mxu0 %v529_v4  ;;  %p547_p1 = scmp.lt.s32.totalorder %s545_s26, %s539_s22 }
  0x1c   : > { %345 = vmatprep.subr.bf16.mxu0 %v603_v1  ;;  %v229_v8 = vpack.c.bf16 %v226_v6, %v226_v6  ;;  %p541_p12 = pnand %p540_p11, %p674_p5 }
  0x1d   : > { %p548_p2 = por %p547_p1, %p546_p0 }
  0x1e   : > { %479 = vmatprep.mubr.msk.bf16.mxu0 %vm333_vm0, %v229_v8  ;;  %p542_p13 = pneg %p541_p12 }
  0x1f   : > { %346 = vmatpush1.bf16.msra.mxu0 %v530_v7 }
  0x20   : > { %347 = vmatprep.subr.bf16.mxu0 %v603_v1  ;;  %p549_p3 = pnand %p548_p2, %p542_p13 }
  0x23   : > { %348 = vmatpush1.bf16.msra.mxu0 %v531_v9 }
  0x24   : > { %349 = vmatprep.subr.bf16.mxu0 %v603_v1 }
  0x27   : > { %350 = vmatpush1.bf16.msra.mxu0 %v532_v10 }
  0x28   : > { %351 = vmatprep.subr.bf16.mxu0 %v603_v1 }
  0x2b   : > { %352 = vmatpush1.bf16.msra.mxu0 %v533_v11 }
  0x2c   : > { %353 = vmatprep.subr.bf16.mxu0 %v603_v1 }
  0x2f   : > { %354 = vmatpush1.bf16.msra.mxu0 %v534_v12 }
  0x30   : > { %355 = vmatprep.subr.bf16.mxu0 %v603_v1 }
  0x33   : > { %356 = vmatpush1.bf16.msra.mxu0 %v535_v13 }
  0x34   : > { %357 = vmatprep.subr.bf16.mxu0 %v603_v1 }
  0x37   : > { %358 = vmatpush1.bf16.msra.mxu0 %v536_v14 }
  0x38   : > { %359 = vmatprep.subr.bf16.mxu0 %v603_v1 }
  0x3b   : > { %360 = vmatpush1.bf16.msra.mxu0 %v537_v15 }
  0x3e   : > { %370 = vmatmul.mubr.bf16.vlgmr.msra.gmra.mrb[0].mxu0 %v228_v16 }
 0x111   : > { %v371_v20 = vpop.f32.mrb[0].mxu0 }
 0x112   : > { %v372_v22 = vadd.f32 %v466_v19, %v371_v20  ;;  %v373_v23 = vpop.f32.mrb[1].mxu0 }
 0x113   : > { %v374_v24 = vpop.f32.mrb[2].mxu0 }
 0x114   : > { %v378_v25 = vadd.f32 %v377_v21, %v372_v22  ;;  %v375_v26 = vpop.f32.mrb[3].mxu0 }
 0x116   : > { %383 = vst.msk [vmem:[%s217_s6 + $0x1] sm:$0xf] %vm382_vm3, %v378_v25 }
 0x117   : > { %552 = shalt.err (!%p549_p3)
}
 0x118   : > { %s553_s23 = scalar_lea.hbm %s739_s15, 128  ;;  %s557_s7 = scalar_lea.hbm %s786_s5, 256 }
 0x119   : > { %p554_p4 = scmp.ne.s32.totalorder %s739_s15, %s553_s23  ;;  %p558_p9 = scmp.lt.u32.totalorder %s739_s15, %s786_s5 }
 0x11a   : > { %p559_p10 = scmp.lt.u32.totalorder %s557_s7, %s553_s23  ;;  %p561_p12 = scmp.lt.u32.totalorder %s553_s23, %s739_s15 }
 0x11b   : > { %p555_p7 = pnand %p554_p4, %p674_p5 }
 0x11c   : > { %p560_p11 = por %p559_p10, %p558_p9 }
 0x11d   : > { %p556_p8 = pneg %p555_p7 }
 0x11e   : > { %p562_p13 = por %p561_p12, %p560_p11 }
 0x120   : > { %p563_p0 = pnand %p562_p13, %p556_p8 }
 0x122   : > { %566 = shalt.err (!%p563_p0)
}
 0x123   : > { %485 = dma.vmem_to_hbm [thread:$0]  (%p674_p5), %s741_s12, 128, %s739_s15, %s387_s16  }
 0x124 PF: > { %p491_p1 = scmp.ge.s32.totalorder %s601_s21, 2  ;;  %s412_s10 = sand.u32 1, %s589_s18  }
 0x125   : > { %s413_s11 = scalar_lea.sflag [#allocation3], %s412_s10 }
 0x126   : > { %p488_p2 = pnand %p491_p1, %p678_p6 }
 0x128   : > { %584 = dma.done.wait (!%p488_p2), %s413_s11, 128  }
 0x129   : > { %586 = vsyncadd (!%p488_p2), %s413_s11, 4294967168  ;;  %p15_p3 = scmp.ge.s32.totalorder %s661_s24, 4   ;;  %s789_s18 = smov %s593_s19 }
 0x12a   : > { %s790_s19 = smov %s597_s20  ;;  %s791_s20 = smov %s672_s27 }
 0x12b   : > { %s792_s21 = smov %s661_s24  ;;  %17 = sbr.rel (!%p15_p3) target bundleno = 3 (0x3), region = 75 }
 0x132   :  { %418 = vsyncpa [#allocation3], 1 }
 0x133   :  { %420 = vsyncpa [#allocation3 + $0x1], 1 }

</bundles_post_ra>
